<compile_context>
chip_gen: v7x
topology: tpu7x:2x2x1
jax: 0.10.0
libtpu: 0.0.40
codegen_flags: <defaults>
</compile_context>

<pallas_src>
import functools

import jax
import jax.numpy as jnp
from jax.experimental import pallas as pl
from jax.experimental.pallas import tpu as pltpu

DROPOUT_P = 0.1
LN_EPS = 1e-5
LANE = 128


def _residual_kernel(seed_ref, x_ref, w_ref, b_ref, g_ref, beta_ref, o_ref,
                     *, d_true, dropout_p, eps):
    """One (TM, Dp) row tile: LayerNorm(x + Dropout(x @ W + b))."""
    x = x_ref[...]                                              # (TM, Dp) f32

    # --- sublayer: Linear(D, D) on the MXU, f32 accumulate ---
    y = jnp.dot(x, w_ref[...], preferred_element_type=jnp.float32) + b_ref[...]

    # --- dropout: counter-hash PRNG over global (row, col) coordinates ---
    tm, dp = o_ref.shape
    row0 = jax.lax.convert_element_type(pl.program_id(0) * tm, jnp.uint32)
    rows = jax.lax.broadcasted_iota(jnp.uint32, (tm, dp), 0) + row0
    cols = jax.lax.broadcasted_iota(jnp.uint32, (tm, dp), 1)
    seed = jax.lax.convert_element_type(seed_ref[0], jnp.uint32)
    h = (rows * jnp.uint32(dp) + cols) ^ (seed * jnp.uint32(0x9E3779B9))
    h = (h ^ (h >> 16)) * jnp.uint32(0x7FEB352D)                # splitmix-style mix
    h = (h ^ (h >> 15)) * jnp.uint32(0x846CA68B)
    h = h ^ (h >> 16)
    keep_thresh = jnp.uint32(int(round((1.0 - dropout_p) * (1 << 24))))
    keep = (h >> 8) < keep_thresh                               # P(keep) = 1 - p
    y = jnp.where(keep, y, 0.0) * jnp.float32(1.0 / (1.0 - dropout_p))

    # --- residual add (padded feature columns stay exactly zero) ---
    z = x + y

    # --- LayerNorm over the true feature dim, single-pass stats ---
    inv_d = jnp.float32(1.0 / d_true)
    s1 = jnp.sum(z, axis=-1, keepdims=True)
    s2 = jnp.sum(z * z, axis=-1, keepdims=True)
    mean = s1 * inv_d
    var = jnp.maximum(s2 * inv_d - mean * mean, 0.0)
    zn = (z - mean) * jax.lax.rsqrt(var + jnp.float32(eps))
    o_ref[...] = (zn * g_ref[...] + beta_ref[...]).astype(o_ref.dtype)


def _round_up(a, m):
    return ((a + m - 1) // m) * m


def residual_forward(x, w, b, gamma, beta, seed, *,
                     dropout_p=DROPOUT_P, eps=LN_EPS, tm_max=512):
    """x: (B, S, D) float32 -> (B, S, D) float32."""
    B, S, D = x.shape
    M = B * S

    Dp = _round_up(max(D, LANE), LANE)          # lane-dense (padded) feature dim
    TM = min(tm_max, _round_up(M, 8))           # row tile, multiple of 8 sublanes
    Mp = _round_up(M, TM)

    x2d = jnp.pad(x.reshape(M, D).astype(jnp.float32),
                  ((0, Mp - M), (0, Dp - D)))
    wp = jnp.pad(w.astype(jnp.float32), ((0, Dp - D), (0, Dp - D)))
    bp = jnp.pad(b.astype(jnp.float32), (0, Dp - D)).reshape(1, Dp)
    gp = jnp.pad(gamma.astype(jnp.float32), (0, Dp - D)).reshape(1, Dp)
    betap = jnp.pad(beta.astype(jnp.float32), (0, Dp - D)).reshape(1, Dp)
    seed_arr = jnp.asarray([seed], dtype=jnp.int32)

    kernel = functools.partial(_residual_kernel, d_true=D,
                               dropout_p=dropout_p, eps=eps)

    cost = pl.CostEstimate(
        flops=2 * Mp * Dp * Dp + 12 * Mp * Dp,
        transcendentals=Mp,
        bytes_accessed=4 * (2 * Mp * Dp + Dp * Dp + 3 * Dp),
    )

    out2d = pl.pallas_call(
        kernel,
        out_shape=jax.ShapeDtypeStruct((Mp, Dp), jnp.float32),
        grid_spec=pltpu.PrefetchScalarGridSpec(
            num_scalar_prefetch=1,                               # seed -> SMEM
            grid=(Mp // TM,),
            in_specs=[
                pl.BlockSpec((TM, Dp), lambda i, s_ref: (i, 0)),  # x row tiles
                pl.BlockSpec((Dp, Dp), lambda i, s_ref: (0, 0)),  # W (resident)
                pl.BlockSpec((1, Dp), lambda i, s_ref: (0, 0)),   # bias
                pl.BlockSpec((1, Dp), lambda i, s_ref: (0, 0)),   # gamma
                pl.BlockSpec((1, Dp), lambda i, s_ref: (0, 0)),   # beta
            ],
            out_specs=pl.BlockSpec((TM, Dp), lambda i, s_ref: (i, 0)),
        ),
        compiler_params=pltpu.CompilerParams(
            dimension_semantics=("parallel",),
            vmem_limit_bytes=64 * 1024 * 1024,
        ),
        cost_estimate=cost,
    )(seed_arr, x2d, wp, bp, gp, betap)

    return out2d[:M, :D].reshape(B, S, D)


if __name__ == "__main__":
    # Shapes implied by the module: batch=2, seq=8, hidden(dimension)=32
    B, S, D = 2, 8, 32

    key = jax.random.PRNGKey(0)
    kx, kw, kb = jax.random.split(key, 3)

    x = jax.random.normal(kx, (B, S, D), dtype=jnp.float32)

    # Sublayer = Linear(D, D), deterministic init (uniform, torch-default scale)
    bound = 1.0 / (D ** 0.5)
    w = jax.random.uniform(kw, (D, D), minval=-bound, maxval=bound, dtype=jnp.float32)
    b = jax.random.uniform(kb, (D,), minval=-bound, maxval=bound, dtype=jnp.float32)

    # LayerNorm params: torch default init (weight=1, bias=0)
    gamma = jnp.ones((D,), dtype=jnp.float32)
    beta = jnp.zeros((D,), dtype=jnp.float32)

    out = residual_forward(x, w, b, gamma, beta, seed=0)
    jax.block_until_ready(out)

    assert out.shape == (B, S, D)
    assert out.dtype == jnp.float32
    # Sanity: per-row layer-norm output should be ~zero-mean (gamma=1, beta=0)
    assert float(jnp.max(jnp.abs(jnp.mean(out, axis=-1)))) < 1e-4

    print("KERNEL_OK")
</pallas_src>

<mosaic_0001>
module attributes {stable_mosaic.version = 11 : i64} {
  func.func @_residual_kernel(%arg0: i32, %arg1: memref<1xi32, #tpu.memory_space<smem>>, %arg2: memref<16x128xf32, #tpu.memory_space<vmem>>, %arg3: memref<128x128xf32, #tpu.memory_space<vmem>>, %arg4: memref<1x128xf32, #tpu.memory_space<vmem>>, %arg5: memref<1x128xf32, #tpu.memory_space<vmem>>, %arg6: memref<1x128xf32, #tpu.memory_space<vmem>>, %arg7: memref<16x128xf32, #tpu.memory_space<vmem>>) attributes {dimension_semantics = [#tpu.dimension_semantics<parallel>], iteration_bounds = array<i64: 1>, scalar_prefetch = 1 : i64, scratch_operands = 0 : i64, tpu.core_type = #tpu.core_type<tc>, window_params = [{transform_indices = @transform_0, window_bounds = array<i64: 16, 128>}, {pipeline_mode = #tpu.pipeline_mode<synchronous>, transform_indices = @transform_1, window_bounds = array<i64: 128, 128>}, {pipeline_mode = #tpu.pipeline_mode<synchronous>, transform_indices = @transform_2, window_bounds = array<i64: 1, 128>}, {pipeline_mode = #tpu.pipeline_mode<synchronous>, transform_indices = @transform_3, window_bounds = array<i64: 1, 128>}, {pipeline_mode = #tpu.pipeline_mode<synchronous>, transform_indices = @transform_4, window_bounds = array<i64: 1, 128>}, {transform_indices = @transform_5, window_bounds = array<i64: 16, 128>}]} {
    %c0 = arith.constant 0 : index
    %c0_0 = arith.constant 0 : index
    %0 = vector.load %arg2[%c0, %c0_0] : memref<16x128xf32, #tpu.memory_space<vmem>>, vector<16x128xf32>
    %c0_1 = arith.constant 0 : index
    %c0_2 = arith.constant 0 : index
    %1 = vector.load %arg3[%c0_1, %c0_2] : memref<128x128xf32, #tpu.memory_space<vmem>>, vector<128x128xf32>
    %cst = arith.constant dense<0.000000e+00> : vector<16x128xf32>
    %2 = tpu.matmul %0, %1, %cst {dimension_numbers = #tpu.dot_dimension_numbers<[1], [0], [0], [1], [0, 0, 1, 1], [], []>} : vector<16x128xf32>, vector<128x128xf32>, vector<16x128xf32> -> vector<16x128xf32>
    %c0_3 = arith.constant 0 : index
    %c0_4 = arith.constant 0 : index
    %3 = vector.load %arg4[%c0_3, %c0_4] : memref<1x128xf32, #tpu.memory_space<vmem>>, vector<1x128xf32>
    %4 = vector.broadcast %3 : vector<1x128xf32> to vector<16x128xf32>
    %5 = arith.addf %2, %4 : vector<16x128xf32>
    %c16_i32 = arith.constant 16 : i32
    %6 = arith.muli %arg0, %c16_i32 : i32
    %7 = tpu.iota {dimensions = array<i32: 0>} : vector<16x128xi32>
    %8 = vector.broadcast %6 : i32 to vector<16x128xi32>
    %9 = arith.addi %7, %8 : vector<16x128xi32>
    %10 = tpu.iota {dimensions = array<i32: 1>} : vector<16x128xi32>
    %c0_5 = arith.constant 0 : index
    %11 = memref.load %arg1[%c0_5] : memref<1xi32, #tpu.memory_space<smem>>
    %c128_i32 = arith.constant 128 : i32
    %12 = vector.broadcast %c128_i32 : i32 to vector<16x128xi32>
    %13 = arith.muli %9, %12 : vector<16x128xi32>
    %14 = arith.addi %13, %10 : vector<16x128xi32>
    %c-1640531527_i32 = arith.constant -1640531527 : i32
    %15 = arith.muli %11, %c-1640531527_i32 : i32
    %16 = vector.broadcast %15 : i32 to vector<16x128xi32>
    %17 = arith.xori %14, %16 : vector<16x128xi32>
    %c16_i32_6 = arith.constant 16 : i32
    %18 = vector.broadcast %c16_i32_6 : i32 to vector<16x128xi32>
    %19 = arith.shrui %17, %18 : vector<16x128xi32>
    %20 = arith.xori %17, %19 : vector<16x128xi32>
    %c2146121005_i32 = arith.constant 2146121005 : i32
    %21 = vector.broadcast %c2146121005_i32 : i32 to vector<16x128xi32>
    %22 = arith.muli %20, %21 : vector<16x128xi32>
    %c15_i32 = arith.constant 15 : i32
    %23 = vector.broadcast %c15_i32 : i32 to vector<16x128xi32>
    %24 = arith.shrui %22, %23 : vector<16x128xi32>
    %25 = arith.xori %22, %24 : vector<16x128xi32>
    %c-2073254261_i32 = arith.constant -2073254261 : i32
    %26 = vector.broadcast %c-2073254261_i32 : i32 to vector<16x128xi32>
    %27 = arith.muli %25, %26 : vector<16x128xi32>
    %c16_i32_7 = arith.constant 16 : i32
    %28 = vector.broadcast %c16_i32_7 : i32 to vector<16x128xi32>
    %29 = arith.shrui %27, %28 : vector<16x128xi32>
    %30 = arith.xori %27, %29 : vector<16x128xi32>
    %c8_i32 = arith.constant 8 : i32
    %31 = vector.broadcast %c8_i32 : i32 to vector<16x128xi32>
    %32 = arith.shrui %30, %31 : vector<16x128xi32>
    %c15099494_i32 = arith.constant 15099494 : i32
    %33 = vector.broadcast %c15099494_i32 : i32 to vector<16x128xi32>
    %34 = arith.cmpi ult, %32, %33 : vector<16x128xi32>
    %cst_8 = arith.constant 0.000000e+00 : f32
    %35 = vector.broadcast %cst_8 : f32 to vector<16x128xf32>
    %36 = arith.select %34, %5, %35 : vector<16x128xi1>, vector<16x128xf32>
    %cst_9 = arith.constant 1.11111116 : f32
    %37 = vector.broadcast %cst_9 : f32 to vector<16x128xf32>
    %38 = arith.mulf %36, %37 : vector<16x128xf32>
    %39 = arith.addf %0, %38 : vector<16x128xf32>
    %cst_10 = arith.constant dense<0.000000e+00> : vector<16xf32>
    %40 = vector.multi_reduction <add>, %39, %cst_10 [1] : vector<16x128xf32> to vector<16xf32>
    %41 = vector.shape_cast %40 : vector<16xf32> to vector<16x1xf32>
    %42 = arith.mulf %39, %39 : vector<16x128xf32>
    %cst_11 = arith.constant dense<0.000000e+00> : vector<16xf32>
    %43 = vector.multi_reduction <add>, %42, %cst_11 [1] : vector<16x128xf32> to vector<16xf32>
    %44 = vector.shape_cast %43 : vector<16xf32> to vector<16x1xf32>
    %cst_12 = arith.constant 3.125000e-02 : f32
    %45 = vector.broadcast %cst_12 : f32 to vector<16x1xf32>
    %46 = arith.mulf %41, %45 : vector<16x1xf32>
    %cst_13 = arith.constant 3.125000e-02 : f32
    %47 = vector.broadcast %cst_13 : f32 to vector<16x1xf32>
    %48 = arith.mulf %44, %47 : vector<16x1xf32>
    %49 = arith.mulf %46, %46 : vector<16x1xf32>
    %50 = arith.subf %48, %49 : vector<16x1xf32>
    %cst_14 = arith.constant 0.000000e+00 : f32
    %51 = vector.broadcast %cst_14 : f32 to vector<16x1xf32>
    %52 = arith.maximumf %50, %51 : vector<16x1xf32>
    %53 = vector.broadcast %46 : vector<16x1xf32> to vector<16x128xf32>
    %54 = arith.subf %39, %53 : vector<16x128xf32>
    %cst_15 = arith.constant 9.99999974E-6 : f32
    %55 = vector.broadcast %cst_15 : f32 to vector<16x1xf32>
    %56 = arith.addf %52, %55 : vector<16x1xf32>
    %57 = math.rsqrt %56 : vector<16x1xf32>
    %58 = vector.broadcast %57 : vector<16x1xf32> to vector<16x128xf32>
    %59 = arith.mulf %54, %58 : vector<16x128xf32>
    %c0_16 = arith.constant 0 : index
    %c0_17 = arith.constant 0 : index
    %60 = vector.load %arg5[%c0_16, %c0_17] : memref<1x128xf32, #tpu.memory_space<vmem>>, vector<1x128xf32>
    %61 = vector.broadcast %60 : vector<1x128xf32> to vector<16x128xf32>
    %62 = arith.mulf %59, %61 : vector<16x128xf32>
    %c0_18 = arith.constant 0 : index
    %c0_19 = arith.constant 0 : index
    %63 = vector.load %arg6[%c0_18, %c0_19] : memref<1x128xf32, #tpu.memory_space<vmem>>, vector<1x128xf32>
    %64 = vector.broadcast %63 : vector<1x128xf32> to vector<16x128xf32>
    %65 = arith.addf %62, %64 : vector<16x128xf32>
    %c0_20 = arith.constant 0 : index
    %c0_21 = arith.constant 0 : index
    %66 = vector.load %arg7[%c0_20, %c0_21] : memref<16x128xf32, #tpu.memory_space<vmem>>, vector<16x128xf32>
    tpu.vector_store %arg7[%c0_20, %c0_21], %65 {strides = array<i32>} : memref<16x128xf32, #tpu.memory_space<vmem>>, vector<16x128xf32>,
    return
  }
  func.func @transform_0(%arg0: i32, %arg1: memref<1xi32, #tpu.memory_space<smem>>) -> (i32, i32) {
    %c0_i32 = arith.constant 0 : i32
    %c0_i32_0 = arith.constant 0 : i32
    return %arg0, %c0_i32 : i32, i32
  }
  func.func @transform_1(%arg0: i32, %arg1: memref<1xi32, #tpu.memory_space<smem>>) -> (i32, i32) {
    %c0_i32 = arith.constant 0 : i32
    %c0_i32_0 = arith.constant 0 : i32
    %c0_i32_1 = arith.constant 0 : i32
    return %c0_i32, %c0_i32_0 : i32, i32
  }
  func.func @transform_2(%arg0: i32, %arg1: memref<1xi32, #tpu.memory_space<smem>>) -> (i32, i32) {
    %c0_i32 = arith.constant 0 : i32
    %c0_i32_0 = arith.constant 0 : i32
    %c0_i32_1 = arith.constant 0 : i32
    return %c0_i32, %c0_i32_0 : i32, i32
  }
  func.func @transform_3(%arg0: i32, %arg1: memref<1xi32, #tpu.memory_space<smem>>) -> (i32, i32) {
    %c0_i32 = arith.constant 0 : i32
    %c0_i32_0 = arith.constant 0 : i32
    %c0_i32_1 = arith.constant 0 : i32
    return %c0_i32, %c0_i32_0 : i32, i32
  }
  func.func @transform_4(%arg0: i32, %arg1: memref<1xi32, #tpu.memory_space<smem>>) -> (i32, i32) {
    %c0_i32 = arith.constant 0 : i32
    %c0_i32_0 = arith.constant 0 : i32
    %c0_i32_1 = arith.constant 0 : i32
    return %c0_i32, %c0_i32_0 : i32, i32
  }
  func.func @transform_5(%arg0: i32, %arg1: memref<1xi32, #tpu.memory_space<smem>>) -> (i32, i32) {
    %c0_i32 = arith.constant 0 : i32
    %c0_i32_0 = arith.constant 0 : i32
    return %arg0, %c0_i32 : i32, i32
  }
}

</mosaic_0001>

<bundles_post_ra>
// kernel: tpu_custom_call.1
= control target key start
LH: loop header
LB: loop body
LE: loop exit
PB: predicated region body
PF: predicated region fallthrough
CT: control target
= control target key end

     0   :  { %12 = vsyncpa [#allocation5], 0  ;;  %s675_s0 = inlined_call_operand.<no memory space> [shape: s32[1], index: 0, kind: input, shape index: {}]   ;;  %s676_s1 = inlined_call_operand.hbm [shape: f32[16,128], index: 1, kind: input, shape index: {}]   ;;  %s677_s2 = inlined_call_operand.hbm [shape: f32[128,128], index: 2, kind: input, shape index: {}]   ;;  %s678_s3 = inlined_call_operand.hbm [shape: f32[1,128], index: 3, kind: input, shape index: {}]   ;;  %s679_s4 = inlined_call_operand.hbm [shape: f32[1,128], index: 4, kind: input, shape index: {}]   ;;  %s680_s5 = inlined_call_operand.hbm [shape: f32[1,128], index: 5, kind: input, shape index: {}]   ;;  %s681_s6 = inlined_call_operand.hbm [shape: f32[16,128], index: 6, kind: output, shape index: {}]  }
   0x1   :  { %13 = vsyncpa [#allocation8], 0 }
   0x2   :  { %14 = vsyncpa [#allocation11], 0 }
   0x3   :  { %15 = vsyncpa [#allocation6], 0  ;;  %s536_s21 = smov [#allocation7]   ;;  %s537_s23 = smov [#allocation10]  }
   0x4   :  { %s33_s22 = sshll.u32 %s536_s21, 4  ;;  %s56_s24 = sshll.u32 %s537_s23, 4  ;;  %s34_s22 = int_to_ptr.vmem [resolvable:$true] %s33_s22  ;;  %s579_s24 = int_to_ptr.vmem [resolvable:$true] %s56_s24 }
   0x5   :  { %s396_s27 = scalar_lea.hbm %s677_s2, 2048 }
   0x6   :  { %p397_p0 = scmp.ne.s32.totalorder %s677_s2, %s396_s27  ;;  %p400_p1 = scmp.lt.u32.totalorder %s396_s27, %s677_s2 }
   0x8   :  { %p402_p2 = pnand %p400_p1, %p397_p0 }
   0xa   :  { %405 = shalt.err (!%p402_p2)
}
   0xb   :  { %s406_s8 = scalar_lea.vmem %s34_s22, 2048  ;;  %p411_p4 = scmp.lt.s32.totalorder %s34_s22, %s34_s22 }
   0xc   :  { %p407_p3 = scmp.ne.s32.totalorder %s34_s22, %s406_s8  ;;  %p412_p5 = scmp.lt.s32.totalorder %s406_s8, %s406_s8 }
   0xe   :  { %p413_p6 = por %p412_p5, %p411_p4 }
  0x10   :  { %p414_p7 = pnand %p413_p6, %p407_p3 }
  0x12   :  { %417 = shalt.err (!%p414_p7)
}
  0x13   :  { %s538_s9 = smov 128   ;;  %s539_s10 = smov 8  }
  0x14   :  { %39 = dma.hbm_to_vmem [thread:$0]  %s677_s2, 2048, %s34_s22, [#allocation8], %s538_s9, %s538_s9, %s539_s10  }
  0x15   :  { %s418_s15 = scalar_lea.hbm %s679_s4, 16 }
  0x16   :  { %p419_p8 = scmp.ne.s32.totalorder %s679_s4, %s418_s15  ;;  %p422_p9 = scmp.lt.u32.totalorder %s418_s15, %s679_s4 }
  0x18   :  { %p424_p10 = pnand %p422_p9, %p419_p8 }
  0x1a   :  { %427 = shalt.err (!%p424_p10)
}
  0x1b   :  { %s428_s20 = scalar_lea.vmem %s579_s24, 16  ;;  %s432_s2 = scalar_lea.vmem %s579_s24, 32 }
  0x1c   :  { %p429_p11 = scmp.ne.s32.totalorder %s579_s24, %s428_s20  ;;  %p433_p12 = scmp.lt.s32.totalorder %s579_s24, %s579_s24 }
  0x1d   :  { %p434_p13 = scmp.lt.s32.totalorder %s432_s2, %s428_s20 }
  0x1f   :  { %p435_p0 = por %p434_p13, %p433_p12 }
  0x21   :  { %p436_p1 = pnand %p435_p0, %p429_p11 }
  0x23   :  { %439 = shalt.err (!%p436_p1)
}
  0x24   :  { %59 = dma.hbm_to_vmem [thread:$0]  %s679_s4, 16, %s579_s24, [#allocation11]  }
  0x25   :  { %s540_s23 = smov [#allocation4]   ;;  %s541_s26 = smov [#allocation9]  }
  0x26   :  { %s21_s25 = sshll.u32 %s540_s23, 4  ;;  %s46_s27 = sshll.u32 %s541_s26, 4  ;;  %s22_s25 = int_to_ptr.vmem [resolvable:$true] %s21_s25  ;;  %s47_s27 = int_to_ptr.vmem [resolvable:$true] %s46_s27 }
  0x27   :  { %s440_s30 = scalar_lea.hbm %s676_s1, 256 }
  0x28   :  { %p441_p2 = scmp.ne.s32.totalorder %s676_s1, %s440_s30  ;;  %p444_p3 = scmp.lt.u32.totalorder %s440_s30, %s676_s1 }
  0x2a   :  { %p446_p4 = pnand %p444_p3, %p441_p2 }
  0x2c   :  { %449 = shalt.err (!%p446_p4)
}
  0x2d   :  { %s450_s4 = scalar_lea.vmem %s22_s25, 256  ;;  %p455_p6 = scmp.lt.s32.totalorder %s22_s25, %s22_s25 }
  0x2e   :  { %p451_p5 = scmp.ne.s32.totalorder %s22_s25, %s450_s4  ;;  %p456_p7 = scmp.lt.s32.totalorder %s450_s4, %s450_s4 }
  0x30   :  { %p457_p8 = por %p456_p7, %p455_p6 }
  0x32   :  { %p458_p9 = pnand %p457_p8, %p451_p5 }
  0x34   :  { %461 = shalt.err (!%p458_p9)
}
  0x35   :  { %27 = dma.hbm_to_vmem [thread:$0]  %s676_s1, 256, %s22_s25, [#allocation5], %s538_s9, %s538_s9, %s539_s10  }
  0x36   :  { %s462_s16 = scalar_lea.hbm %s678_s3, 16 }
  0x37   :  { %p463_p10 = scmp.ne.s32.totalorder %s678_s3, %s462_s16  ;;  %p466_p11 = scmp.lt.u32.totalorder %s462_s16, %s678_s3 }
  0x39   :  { %p468_p12 = pnand %p466_p11, %p463_p10 }
  0x3b   :  { %471 = shalt.err (!%p468_p12)
}
  0x3c   :  { %s472_s2 = scalar_lea.vmem %s47_s27, 16  ;;  %s476_s21 = scalar_lea.vmem %s47_s27, 32 }
  0x3d   :  { %p473_p13 = scmp.ne.s32.totalorder %s47_s27, %s472_s2  ;;  %p477_p0 = scmp.lt.s32.totalorder %s47_s27, %s47_s27 }
  0x3e   :  { %p478_p1 = scmp.lt.s32.totalorder %s476_s21, %s472_s2 }
  0x40   :  { %p479_p2 = por %p478_p1, %p477_p0 }
  0x42   :  { %p480_p3 = pnand %p479_p2, %p473_p13 }
  0x44   :  { %483 = shalt.err (!%p480_p3)
}
  0x45   :  { %49 = dma.hbm_to_vmem [thread:$0]  %s678_s3, 16, %s47_s27, [#allocation8]  }
  0x46   :  { %s542_s23 = smov [#allocation12]   ;;  %s484_s29 = scalar_lea.hbm %s680_s5, 16 }
  0x47   :  { %s66_s25 = sshll.u32 %s542_s23, 4  ;;  %p485_p4 = scmp.ne.s32.totalorder %s680_s5, %s484_s29  ;;  %s67_s25 = int_to_ptr.vmem [resolvable:$true] %s66_s25 }
  0x48   :  { %p488_p5 = scmp.lt.u32.totalorder %s484_s29, %s680_s5 }
  0x4a   :  { %p490_p6 = pnand %p488_p5, %p485_p4 }
  0x4c   :  { %493 = shalt.err (!%p490_p6)
}
  0x4d   :  { %s494_s12 = scalar_lea.vmem %s67_s25, 16  ;;  %s498_s3 = scalar_lea.vmem %s67_s25, 32 }
  0x4e   :  { %p495_p7 = scmp.ne.s32.totalorder %s67_s25, %s494_s12  ;;  %p499_p8 = scmp.lt.s32.totalorder %s67_s25, %s67_s25 }
  0x4f   :  { %p500_p9 = scmp.lt.s32.totalorder %s498_s3, %s494_s12 }
  0x51   :  { %p501_p10 = por %p500_p9, %p499_p8 }
  0x53   :  { %p502_p11 = pnand %p501_p10, %p495_p7 }
  0x55   :  { %505 = shalt.err (!%p502_p11)
}
  0x56   :  { %69 = dma.hbm_to_vmem [thread:$0]  %s680_s5, 16, %s67_s25, [#allocation11]  }
  0x57   :  { %528 = dma.done.wait [#allocation5], 256  }
  0x58   :  { %529 = vsyncadd [#allocation5], 4294967040 }
  0x59   :  { %530 = dma.done.wait [#allocation8], 2064  }
  0x5a   :  { %531 = vsyncadd [#allocation8], 4294965232 }
  0x5b   :  { %532 = dma.done.wait [#allocation11], 32  }
  0x5c   :  { %533 = vsyncadd [#allocation11], 4294967264  ;;  %v87_v0 = vld [vmem:[#allocation7] sm:$0xff]  ;;  %v88_v1 = vld [vmem:[#allocation7 + $0x8] sm:$0xff]  ;;  %v186_v26 = vlaneseq  ;;  %s199_s13 = smul.u32 2654435769, %s675_s0 }
  0x5d   :  { %v89_v2 = vld [vmem:[#allocation7 + $0x10] sm:$0xff]  ;;  %v352_v3 = vpack.c.bf16 %v88_v1, %v87_v0  ;;  %v90_v4 = vld [vmem:[#allocation7 + $0x18] sm:$0xff]  ;;  %v91_v6 = vld [vmem:[#allocation7 + $0x20] sm:$0xff]  ;;  %s543_s0 = smov [#allocation13]  }
  0x5e   :  { %v356_v5 = vpack.c.bf16 %v90_v4, %v89_v2  ;;  %v92_v7 = vld [vmem:[#allocation7 + $0x28] sm:$0xff]  ;;  %v653_v9 = vld [vmem:[#allocation4] sm:$0xff]  ;;  %v94_v11 = vld [vmem:[#allocation7 + $0x38] sm:$0xff]  ;;  %v187_v27 = vshrl.u32 %v186_v26, 7  ;;  %v193_v29 = vand.u32 127, %v186_v26  ;;  %v200_v33 = vstv %s199_s13  ;;  %s282_s14 = sshll.u32 %s543_s0, 4  ;;  %s283_s14 = int_to_ptr.vmem [resolvable:$true] %s282_s14 }
  0x5f   :  { %353 = vmatprep.subr.bf16.mxu0 %v352_v3  ;;  %v360_v8 = vpack.c.bf16 %v92_v7, %v91_v6  ;;  %v93_v10 = vld [vmem:[#allocation7 + $0x30] sm:$0xff]  ;;  %349 = vmatprep.mubr.f32.mxu0 %v653_v9  ;;  %v95_v13 = vld [vmem:[#allocation7 + $0x40] sm:$0xff]  ;;  %v96_v14 = vld [vmem:[#allocation7 + $0x48] sm:$0xff]  ;;  %s506_s15 = scalar_lea.vmem %s283_s14, 256  ;;  %p511_p13 = scmp.lt.s32.totalorder %s283_s14, %s283_s14 }
  0x60   :  { %355 = vmatpush3.bf16.msra.mxu0 %v352_v3  ;;  %v364_v12 = vpack.c.bf16 %v94_v11, %v93_v10  ;;  %v368_v15 = vpack.c.bf16 %v96_v14, %v95_v13  ;;  %v97_v16 = vld [vmem:[#allocation7 + $0x50] sm:$0xff]  ;;  %v98_v17 = vld [vmem:[#allocation7 + $0x58] sm:$0xff]  ;;  %v99_v19 = vld [vmem:[#allocation7 + $0x60] sm:$0xff]  ;;  %v188_v28 = vadd.s32 8, %v187_v27  ;;  %v195_v31 = vmul.u32 128, %v187_v27  ;;  %p507_p12 = scmp.ne.s32.totalorder %s283_s14, %s506_s15  ;;  %p512_p0 = scmp.lt.s32.totalorder %s506_s15, %s506_s15 }
  0x61   :  { %357 = vmatprep.subr.bf16.mxu0 %v356_v5  ;;  %v372_v18 = vpack.c.bf16 %v98_v17, %v97_v16  ;;  %v100_v20 = vld [vmem:[#allocation7 + $0x68] sm:$0xff]  ;;  %v101_v22 = vld [vmem:[#allocation7 + $0x70] sm:$0xff]  ;;  %v102_v23 = vld [vmem:[#allocation7 + $0x78] sm:$0xff] }
  0x62   :  { %v376_v21 = vpack.c.bf16 %v100_v20, %v99_v19  ;;  %v380_v24 = vpack.c.bf16 %v102_v23, %v101_v22  ;;  %v86_v25 = vld [vmem:[#allocation4 + $0x8] sm:$0xff]  ;;  %v196_v30 = vmul.u32 128, %v188_v28  ;;  %v197_v34 = vadd.s32 %v195_v31, %v193_v29  ;;  %v296_v55 = vld [vmem:[#allocation9] ss:$0 sm:$0xff]  ;;  %v297_v22 = vld [vmem:[#allocation10] ss:$0 sm:$0xff]  ;;  %p513_p1 = por %p512_p0, %p511_p13 }
  0x64   :  { %359 = vmatpush3.bf16.msra.mxu0 %v356_v5  ;;  %v198_v32 = vadd.s32 %v196_v30, %v193_v29  ;;  %v201_v36 = vxor.u32 %v200_v33, %v197_v34  ;;  %p514_p2 = pnand %p513_p1, %p507_p12 }
  0x65   :  { %361 = vmatprep.subr.bf16.mxu0 %v360_v8 }
  0x66   :  { %v202_v35 = vxor.u32 %v200_v33, %v198_v32  ;;  %v203_v38 = vshrl.u32 %v201_v36, 16 }
  0x68   :  { %363 = vmatpush3.bf16.msra.mxu0 %v360_v8  ;;  %v204_v37 = vshrl.u32 %v202_v35, 16  ;;  %v205_v40 = vxor.u32 %v203_v38, %v201_v36 }
  0x69   :  { %365 = vmatprep.subr.bf16.mxu0 %v364_v12 }
  0x6a   :  { %v206_v39 = vxor.u32 %v204_v37, %v202_v35  ;;  %v207_v42 = vmul.u32 2146121005, %v205_v40 }
  0x6c   :  { %367 = vmatpush3.bf16.msra.mxu0 %v364_v12  ;;  %v208_v41 = vmul.u32 2146121005, %v206_v39  ;;  %v209_v44 = vshrl.u32 %v207_v42, 15 }
  0x6d   :  { %369 = vmatprep.subr.bf16.mxu0 %v368_v15 }
  0x6e   :  { %v210_v43 = vshrl.u32 %v208_v41, 15  ;;  %v211_v46 = vxor.u32 %v209_v44, %v207_v42 }
  0x70   :  { %371 = vmatpush3.bf16.msra.mxu0 %v368_v15  ;;  %v212_v45 = vxor.u32 %v210_v43, %v208_v41  ;;  %v213_v48 = vmul.u32 2221713035, %v211_v46 }
  0x71   :  { %373 = vmatprep.subr.bf16.mxu0 %v372_v18 }
  0x72   :  { %v214_v47 = vmul.u32 2221713035, %v212_v45  ;;  %v215_v50 = vshrl.u32 %v213_v48, 16 }
  0x74   :  { %375 = vmatpush3.bf16.msra.mxu0 %v372_v18  ;;  %v216_v49 = vshrl.u32 %v214_v47, 16  ;;  %v217_v52 = vxor.u32 %v215_v50, %v213_v48 }
  0x75   :  { %377 = vmatprep.subr.bf16.mxu0 %v376_v21 }
  0x76   :  { %v218_v51 = vxor.u32 %v216_v49, %v214_v47  ;;  %v219_v54 = vshrl.u32 %v217_v52, 8 }
  0x78   :  { %379 = vmatpush3.bf16.msra.mxu0 %v376_v21  ;;  %v220_v53 = vshrl.u32 %v218_v51, 8  ;;  %vm221_vm1 = vcmp.lt.u32.totalorder %v219_v54, 15099494 }
  0x79   :  { %381 = vmatprep.subr.bf16.mxu0 %v380_v24 }
  0x7a   :  { %vm222_vm0 = vcmp.lt.u32.totalorder %v220_v53, 15099494 }
  0x7c   :  { %383 = vmatpush3.bf16.msra.mxu0 %v380_v24  ;;  %v298_v24 = vld [vmem:[#allocation12] ss:$0 sm:$0xff] }
  0x7f   :  { %350 = vmatmul.mubr.f32.vlgmr.msra.gmra.mrb[0].mxu0 %v86_v25 }
 0x152   :  { %v351_v56 = vpop.f32.mrb[0].mxu0 }
 0x153   :  { %v182_v57 = vadd.f32 %v351_v56, %v296_v55  ;;  %v176_v58 = vpop.f32.mrb[1].mxu0 }
 0x154   :  { %v177_v59 = vadd.f32 %v296_v55, %v176_v58 }
 0x155   :  { %v224_v60 = vsel %vm222_vm0, %v182_v57, 0.0 }
 0x156   :  { %v223_v61 = vsel %vm221_vm1, %v177_v59, 0.0  ;;  %v226_v62 = vmul.f32 1.1111112, %v224_v60 }
 0x157   :  { %v225_v63 = vmul.f32 1.1111112, %v223_v61 }
 0x158   :  { %v228_v2 = vadd.f32 %v226_v62, %v86_v25 }
 0x159   :  { %v227_v0 = vadd.f32 %v225_v63, %v653_v9 }
 0x15a   :  { %v234_v3 = vmul.f32 %v228_v2, %v228_v2 }
 0x15b   :  { %229 = vadd.xlane.f32.xlu0 %v227_v0  ;;  %v233_v1 = vmul.f32 %v227_v0, %v227_v0 }
 0x15d   :  { %235 = vadd.xlane.f32.xlu1 %v233_v1 }
 0x15f   :  { %231 = vadd.xlane.f32.xlu0 %v228_v2 }
 0x161   :  { %237 = vadd.xlane.f32.xlu1 %v234_v3 }
 0x1e8   :  { %v230_v4 = vpop.xlane.xlu0 %229 }
 0x1e9   :  { %v239_v5 = vmul.f32 0.03125, %v230_v4 }
 0x1ea   :  { %v236_v6 = vpop.xlane.xlu1 %235 }
 0x1eb   :  { %v243_v7 = vmul.f32 %v239_v5, %v239_v5  ;;  %v241_v8 = vmul.f32 0.03125, %v236_v6  ;;  %v249_v20 = vsub.f32 %v227_v0, %v239_v5 }
 0x1ec   :  { %v232_v10 = vpop.xlane.xlu0 %231 }
 0x1ed   :  { %v245_v11 = vsub.f32 %v241_v8, %v243_v7  ;;  %v240_v12 = vmul.f32 0.03125, %v232_v10 }
 0x1ee   :  { %v238_v13 = vpop.xlane.xlu1 %237 }
 0x1ef   :  { %v247_v14 = vmax.f32 %v245_v11, 0.0  ;;  %v244_v15 = vmul.f32 %v240_v12, %v240_v12  ;;  %v242_v16 = vmul.f32 0.03125, %v238_v13  ;;  %v250_v25 = vsub.f32 %v228_v2, %v240_v12 }
 0x1f1   :  { %v251_v9 = vadd.f32 1e-05, %v247_v14  ;;  %v246_v17 = vsub.f32 %v242_v16, %v244_v15 }
 0x1f3   :  { %392 = vrsqrt.f32 %v251_v9  ;;  %v248_v18 = vmax.f32 %v246_v17, 0.0 }
 0x1f5   :  { %v252_v19 = vadd.f32 1e-05, %v248_v18 }
 0x1f7   :  { %394 = vrsqrt.f32 %v252_v19 }
 0x1fd   :  { %v393_v21 = vpop.eup %392 }
 0x1fe   :  { %v255_v23 = vmul.f32 %v393_v21, %v249_v20 }
 0x200   :  { %v264_v26 = vmul.f32 %v297_v22, %v255_v23 }
 0x201   :  { %v395_v27 = vpop.eup %394 }
 0x202   :  { %v256_v28 = vmul.f32 %v395_v27, %v250_v25  ;;  %v273_v29 = vadd.f32 %v298_v24, %v264_v26 }
 0x204   :  { %v265_v30 = vmul.f32 %v297_v22, %v256_v28  ;;  %275 = vst [vmem:[#allocation13] sm:$0xff] %v273_v29 }
 0x206   :  { %v274_v31 = vadd.f32 %v298_v24, %v265_v30 }
 0x208   :  { %276 = vst [vmem:[#allocation13 + $0x8] sm:$0xff] %v274_v31 }
 0x209   :  { %517 = shalt.err (!%p514_p2)
}
 0x20a   :  { %s518_s18 = scalar_lea.hbm %s681_s6, 256 }
 0x20b   :  { %p519_p3 = scmp.ne.s32.totalorder %s681_s6, %s518_s18  ;;  %p522_p4 = scmp.lt.u32.totalorder %s518_s18, %s681_s6 }
 0x20d   :  { %p524_p5 = pnand %p522_p4, %p519_p3 }
 0x20f   :  { %527 = shalt.err (!%p524_p5)
}
 0x210   :  { %288 = dma.vmem_to_hbm [thread:$0]  %s283_s14, 256, %s681_s6, [#allocation6], %s538_s9, %s538_s9, %s539_s10  }
 0x211   :  { %534 = dma.done.wait [#allocation6], 256  }
 0x212   :  { %535 = vsyncadd [#allocation6], 4294967040 }
 0x213   :  { %292 = vsyncpa [#allocation5], 1 }
 0x214   :  { %293 = vsyncpa [#allocation8], 1 }
 0x215   :  { %294 = vsyncpa [#allocation11], 1 }
 0x216   :  { %295 = vsyncpa [#allocation6], 1 }

</bundles_post_ra>
